<compile_context>
chip_gen: v6e
topology: v6e:2x2x1
jax: 0.10.0
libtpu: 0.0.40
codegen_flags: <defaults>
</compile_context>

<pallas_src>
import functools

import jax
import jax.numpy as jnp
from jax.experimental import pallas as pl
from jax.experimental.pallas import tpu as pltpu

_LANES = 128
_MAX_BLOCK_ROWS = 4096   # (4096, 128) f32 block = 2 MiB / input / buffer (sweep 4096-8192)
_NUM_CORES = 2           # leading "parallel" axis; engages both TCs on v7x, harmless elsewhere


def _mse_kernel(n_ref, x_ref, t_ref, out_ref, *, block_rows, blocks_per_core, needs_mask):
    """Accumulate sum((x - t)^2) per core into the resident (8, 128) output block.

    n_ref    : (1,) int32 SMEM (scalar prefetch) -- true (unpadded) element count
    x_ref    : VMEM tile of the input  (native dtype), (block_rows, 128) or flat 1-D
    t_ref    : VMEM tile of the target (native dtype), same shape as x_ref
    out_ref  : (8, 128) f32 VMEM output block (one row of blocks per core); it is
               revisited across the inner grid axis, so it doubles as the accumulator.
    """
    c = pl.program_id(0)          # core / output-row index ("parallel")
    j = pl.program_id(1)          # block index within this core's range ("arbitrary")
    block_elems = block_rows * _LANES

    @pl.when(j == 0)
    def _():
        out_ref[...] = jnp.zeros_like(out_ref)

    n = n_ref[0]
    # First element (row-major) covered by this logical block. The index_map clamps
    # the DMA window in-bounds; logically-OOB duplicated blocks are skipped below.
    start = (c * blocks_per_core + j) * block_elems

    def accumulate(mask_fn=None):
        xv = x_ref[...].astype(jnp.float32).reshape(block_rows, _LANES)
        tv = t_ref[...].astype(jnp.float32).reshape(block_rows, _LANES)
        d = xv - tv
        if mask_fn is not None:
            d = mask_fn(d)
        sq = d * d
        # (block_rows, 128) -> (block_rows//8, 8, 128); axis-0 sum is pure per-vreg
        # VPU adds (no cross-lane traffic), accumulated into the (8, 128) output.
        out_ref[...] += sq.reshape(block_rows // 8, 8, _LANES).sum(axis=0)

    if needs_mask:
        # Full, fully in-range block: unmasked fast path (the common case).
        @pl.when(start + block_elems <= n)
        def _():
            accumulate()

        # Boundary block: mask out garbage past the true element count.
        @pl.when(jnp.logical_and(start < n, start + block_elems > n))
        def _():
            def mask(d):
                row = jax.lax.broadcasted_iota(jnp.int32, (block_rows, _LANES), 0)
                lane = jax.lax.broadcasted_iota(jnp.int32, (block_rows, _LANES), 1)
                valid = (start + row * _LANES + lane) < n
                return jnp.where(valid, d, 0.0)
            accumulate(mask)

        # Blocks with start >= n (clamped overflow when num_blocks is odd or the
        # tensor is tiny): contribute nothing.
    else:
        accumulate()


def _round_up(v, m):
    return (v + m - 1) // m * m


def content_loss_forward(x, target, *, block_rows_max=_MAX_BLOCK_ROWS):
    """Returns (input, mse_loss) -- matching ContentLoss.forward + self.loss."""
    assert x.shape == target.shape, "input/target shape mismatch"
    n = x.size
    assert 0 < n < (1 << 30), "element count must fit comfortably in int32 index math"

    # Flatten is free (layout-preserving) for contiguous arrays; keep native dtype
    # (cast to f32 happens inside the kernel) to minimize HBM traffic.
    xf = x.reshape(-1)
    tf = target.reshape(-1)

    # Sub-32-bit dtypes pack along sublanes: block rows must be a multiple of the
    # packed sublane tile (8 for f32, 16 for bf16, 32 for int8/fp8).
    packing = max(1, 4 // jnp.dtype(x.dtype).itemsize)
    min_rows = 8 * packing
    rows_needed = pl.cdiv(n, _LANES)
    block_rows = min(_round_up(block_rows_max, min_rows),
                     _round_up(rows_needed, min_rows))
    block_elems = block_rows * _LANES

    num_blocks = pl.cdiv(n, block_elems)
    blocks_per_core = pl.cdiv(num_blocks, _NUM_CORES)
    # Mask path only compiled in if the (cores x blocks_per_core) coverage overshoots n.
    needs_mask = (_NUM_CORES * blocks_per_core * block_elems) != n

    def block_index(c, j):
        # Clamp so the DMA window always stays inside the array; duplicated blocks
        # from the clamp are skipped in-kernel via `start >= n`.
        return jnp.minimum(c * blocks_per_core + j, num_blocks - 1)

    if n % _LANES == 0:
        # Free reshape to a lane-dense 2-D view (no pad, no copy).
        rows = n // _LANES
        xk = xf.reshape(rows, _LANES)
        tk = tf.reshape(rows, _LANES)
        in_block = (block_rows, _LANES)
        in_map = lambda c, j, n_ref: (block_index(c, j), 0)
    else:
        # Ragged element count: no jnp.pad full copy; feed the flat 1-D array with a
        # 1-D BlockSpec (multiple of 128) and mask the boundary block in-kernel.
        xk, tk = xf, tf
        in_block = (block_elems,)
        in_map = lambda c, j, n_ref: (block_index(c, j),)

    kernel = functools.partial(
        _mse_kernel,
        block_rows=block_rows,
        blocks_per_core=blocks_per_core,
        needs_mask=needs_mask,
    )

    itemsize = jnp.dtype(x.dtype).itemsize
    cost = pl.CostEstimate(
        flops=3 * n,            # sub + mul + accumulate-add per element
        transcendentals=0,
        bytes_accessed=2 * n * itemsize + _NUM_CORES * 8 * _LANES * 4 + 4,
    )

    partial_sums = pl.pallas_call(
        kernel,
        out_shape=jax.ShapeDtypeStruct((_NUM_CORES * 8, _LANES), jnp.float32),
        grid_spec=pltpu.PrefetchScalarGridSpec(
            num_scalar_prefetch=1,           # true element count -> SMEM
            grid=(_NUM_CORES, blocks_per_core),
            in_specs=[pl.BlockSpec(in_block, in_map),
                      pl.BlockSpec(in_block, in_map)],
            out_specs=pl.BlockSpec((8, _LANES), lambda c, j, n_ref: (c, 0)),
        ),
        compiler_params=pltpu.CompilerParams(
            dimension_semantics=("parallel", "arbitrary"),
            # 2 inputs x 2 pipeline buffers x 2 MiB = 8 MiB of windows plus Mosaic
            # temporaries; raise the limit explicitly so v5e's 16 MiB default never
            # trips, while staying well under v7x's 64 MiB physical VMEM.
            vmem_limit_bytes=48 * 1024 * 1024,
        ),
        cost_estimate=cost,
    )(jnp.array([n], dtype=jnp.int32), xk, tk)

    # Final tiny reduction + mean in the wrapper (2 x (8,128) partials).
    loss = jnp.sum(partial_sums) / n
    # forward returns the input unchanged (identity); loss is the scalar MSE.
    return x, loss


if __name__ == "__main__":
    key = jax.random.PRNGKey(0)
    k1, k2, k3, k4, k5, k6, k7, k8 = jax.random.split(key, 8)

    # Primary: small NCHW feature maps, consistent with NST conv features.
    B, C, H, W = 2, 4, 16, 16
    x = jax.random.normal(k1, (B, C, H, W), dtype=jnp.float32)
    target = jax.random.normal(k2, (B, C, H, W), dtype=jnp.float32)
    out, loss = content_loss_forward(x, target)
    out = jax.block_until_ready(out)
    loss = jax.block_until_ready(loss)
    ref_loss = jnp.mean((x - target) ** 2)
    assert jnp.allclose(loss, ref_loss, rtol=1e-5, atol=1e-6), (loss, ref_loss)
    assert jnp.array_equal(out, x)

    # Ragged element count (n % 128 != 0 -> no-pad flat 1-D path with boundary mask).
    xr = jax.random.normal(k3, (3, 5, 7, 11), dtype=jnp.float32)
    tr = jax.random.normal(k4, (3, 5, 7, 11), dtype=jnp.float32)
    out_r, loss_r = content_loss_forward(xr, tr)
    loss_r = jax.block_until_ready(loss_r)
    ref_r = jnp.mean((xr - tr) ** 2)
    assert jnp.allclose(loss_r, ref_r, rtol=1e-5, atol=1e-6), (loss_r, ref_r)
    assert jnp.array_equal(out_r, xr)

    # Multi-block, exact coverage (exercises cross-step accumulation on both cores)
    # using a small forced block size so the test data stays tiny.
    xb = jax.random.normal(k5, (2, 4, 32, 128), dtype=jnp.float32)
    tb = jax.random.normal(k6, (2, 4, 32, 128), dtype=jnp.float32)
    _, loss_b = content_loss_forward(xb, tb, block_rows_max=64)
    loss_b = jax.block_until_ready(loss_b)
    ref_b = jnp.mean((xb - tb) ** 2)
    assert jnp.allclose(loss_b, ref_b, rtol=1e-5, atol=1e-6), (loss_b, ref_b)

    # Multi-block with a partial boundary block and a skipped (clamped) overflow
    # block (odd block count) on the aligned 2-D path.
    xm = jax.random.normal(k7, (2, 4, 36, 128), dtype=jnp.float32)
    tm = jax.random.normal(k8, (2, 4, 36, 128), dtype=jnp.float32)
    _, loss_m = content_loss_forward(xm, tm, block_rows_max=64)
    loss_m = jax.block_until_ready(loss_m)
    ref_m = jnp.mean((xm - tm) ** 2)
    assert jnp.allclose(loss_m, ref_m, rtol=1e-5, atol=1e-6), (loss_m, ref_m)

    print("KERNEL_OK")
</pallas_src>

<mosaic_0001>
module attributes {stable_mosaic.version = 11 : i64} {
  func.func @_mse_kernel(%arg0: i32, %arg1: i32, %arg2: memref<1xi32, #tpu.memory_space<smem>>, %arg3: memref<16x128xf32, #tpu.memory_space<vmem>>, %arg4: memref<16x128xf32, #tpu.memory_space<vmem>>, %arg5: memref<8x128xf32, #tpu.memory_space<vmem>>) attributes {dimension_semantics = [#tpu.dimension_semantics<parallel>, #tpu.dimension_semantics<arbitrary>], iteration_bounds = array<i64: 2, 1>, scalar_prefetch = 1 : i64, scratch_operands = 0 : i64, tpu.core_type = #tpu.core_type<tc>, window_params = [{transform_indices = @transform_0, window_bounds = array<i64: 16, 128>}, {transform_indices = @transform_1, window_bounds = array<i64: 16, 128>}, {transform_indices = @transform_2, window_bounds = array<i64: 8, 128>}]} {
    %c0_i32 = arith.constant 0 : i32
    %0 = arith.cmpi eq, %arg1, %c0_i32 : i32
    %1 = arith.extui %0 : i1 to i32
    %c0_i32_0 = arith.constant 0 : i32
    %2 = arith.cmpi ne, %1, %c0_i32_0 : i32
    scf.if %2 {
      %cst = arith.constant 0.000000e+00 : f32
      %17 = vector.broadcast %cst : f32 to vector<8x128xf32>
      %c0_5 = arith.constant 0 : index
      %c0_6 = arith.constant 0 : index
      %18 = vector.load %arg5[%c0_5, %c0_6] : memref<8x128xf32, #tpu.memory_space<vmem>>, vector<8x128xf32>
      tpu.vector_store %arg5[%c0_5, %c0_6], %17 {strides = array<i32>} : memref<8x128xf32, #tpu.memory_space<vmem>>, vector<8x128xf32>,
    } else {
    }
    %c0 = arith.constant 0 : index
    %3 = memref.load %arg2[%c0] : memref<1xi32, #tpu.memory_space<smem>>
    %c1_i32 = arith.constant 1 : i32
    %4 = arith.muli %arg0, %c1_i32 : i32
    %5 = arith.addi %4, %arg1 : i32
    %c2048_i32 = arith.constant 2048 : i32
    %6 = arith.muli %5, %c2048_i32 : i32
    %c2048_i32_1 = arith.constant 2048 : i32
    %7 = arith.addi %6, %c2048_i32_1 : i32
    %8 = arith.cmpi sle, %7, %3 : i32
    %9 = arith.extui %8 : i1 to i32
    %c0_i32_2 = arith.constant 0 : i32
    %10 = arith.cmpi ne, %9, %c0_i32_2 : i32
    scf.if %10 {
      %c0_5 = arith.constant 0 : index
      %c0_6 = arith.constant 0 : index
      %17 = vector.load %arg3[%c0_5, %c0_6] : memref<16x128xf32, #tpu.memory_space<vmem>>, vector<16x128xf32>
      %c0_7 = arith.constant 0 : index
      %c0_8 = arith.constant 0 : index
      %18 = vector.load %arg4[%c0_7, %c0_8] : memref<16x128xf32, #tpu.memory_space<vmem>>, vector<16x128xf32>
      %19 = arith.subf %17, %18 : vector<16x128xf32>
      %20 = arith.mulf %19, %19 : vector<16x128xf32>
      %c0_9 = arith.constant 0 : index
      %c0_10 = arith.constant 0 : index
      %21 = vector.load %arg5[%c0_9, %c0_10] : memref<8x128xf32, #tpu.memory_space<vmem>>, vector<8x128xf32>
      %22 = vector.shape_cast %20 : vector<16x128xf32> to vector<2x8x128xf32>
      %cst = arith.constant dense<0.000000e+00> : vector<8x128xf32>
      %23 = vector.multi_reduction <add>, %22, %cst [0] : vector<2x8x128xf32> to vector<8x128xf32>
      %24 = arith.addf %21, %23 : vector<8x128xf32>
      %c0_11 = arith.constant 0 : index
      %c0_12 = arith.constant 0 : index
      %25 = vector.load %arg5[%c0_11, %c0_12] : memref<8x128xf32, #tpu.memory_space<vmem>>, vector<8x128xf32>
      tpu.vector_store %arg5[%c0_11, %c0_12], %24 {strides = array<i32>} : memref<8x128xf32, #tpu.memory_space<vmem>>, vector<8x128xf32>,
    } else {
    }
    %11 = arith.cmpi slt, %6, %3 : i32
    %c2048_i32_3 = arith.constant 2048 : i32
    %12 = arith.addi %6, %c2048_i32_3 : i32
    %13 = arith.cmpi sgt, %12, %3 : i32
    %14 = arith.andi %11, %13 : i1
    %15 = arith.extui %14 : i1 to i32
    %c0_i32_4 = arith.constant 0 : i32
    %16 = arith.cmpi ne, %15, %c0_i32_4 : i32
    scf.if %16 {
      %c0_5 = arith.constant 0 : index
      %c0_6 = arith.constant 0 : index
      %17 = vector.load %arg3[%c0_5, %c0_6] : memref<16x128xf32, #tpu.memory_space<vmem>>, vector<16x128xf32>
      %c0_7 = arith.constant 0 : index
      %c0_8 = arith.constant 0 : index
      %18 = vector.load %arg4[%c0_7, %c0_8] : memref<16x128xf32, #tpu.memory_space<vmem>>, vector<16x128xf32>
      %19 = arith.subf %17, %18 : vector<16x128xf32>
      %20 = tpu.iota {dimensions = array<i32: 0>} : vector<16x128xi32>
      %21 = tpu.iota {dimensions = array<i32: 1>} : vector<16x128xi32>
      %c128_i32 = arith.constant 128 : i32
      %22 = vector.broadcast %c128_i32 : i32 to vector<16x128xi32>
      %23 = arith.muli %20, %22 : vector<16x128xi32>
      %24 = vector.broadcast %6 : i32 to vector<16x128xi32>
      %25 = arith.addi %24, %23 : vector<16x128xi32>
      %26 = arith.addi %25, %21 : vector<16x128xi32>
      %27 = vector.broadcast %3 : i32 to vector<16x128xi32>
      %28 = arith.cmpi slt, %26, %27 : vector<16x128xi32>
      %cst = arith.constant 0.000000e+00 : f32
      %29 = vector.broadcast %cst : f32 to vector<16x128xf32>
      %30 = arith.select %28, %19, %29 : vector<16x128xi1>, vector<16x128xf32>
      %31 = arith.mulf %30, %30 : vector<16x128xf32>
      %c0_9 = arith.constant 0 : index
      %c0_10 = arith.constant 0 : index
      %32 = vector.load %arg5[%c0_9, %c0_10] : memref<8x128xf32, #tpu.memory_space<vmem>>, vector<8x128xf32>
      %33 = vector.shape_cast %31 : vector<16x128xf32> to vector<2x8x128xf32>
      %cst_11 = arith.constant dense<0.000000e+00> : vector<8x128xf32>
      %34 = vector.multi_reduction <add>, %33, %cst_11 [0] : vector<2x8x128xf32> to vector<8x128xf32>
      %35 = arith.addf %32, %34 : vector<8x128xf32>
      %c0_12 = arith.constant 0 : index
      %c0_13 = arith.constant 0 : index
      %36 = vector.load %arg5[%c0_12, %c0_13] : memref<8x128xf32, #tpu.memory_space<vmem>>, vector<8x128xf32>
      tpu.vector_store %arg5[%c0_12, %c0_13], %35 {strides = array<i32>} : memref<8x128xf32, #tpu.memory_space<vmem>>, vector<8x128xf32>,
    } else {
    }
    return
  }
  func.func @transform_0(%arg0: i32, %arg1: i32, %arg2: memref<1xi32, #tpu.memory_space<smem>>) -> (i32, i32) {
    %c1_i32 = arith.constant 1 : i32
    %0 = arith.muli %arg0, %c1_i32 : i32
    %1 = arith.addi %0, %arg1 : i32
    %c0_i32 = arith.constant 0 : i32
    %2 = arith.minsi %1, %c0_i32 : i32
    %c0_i32_0 = arith.constant 0 : i32
    %c0_i32_1 = arith.constant 0 : i32
    return %2, %c0_i32_0 : i32, i32
  }
  func.func @transform_1(%arg0: i32, %arg1: i32, %arg2: memref<1xi32, #tpu.memory_space<smem>>) -> (i32, i32) {
    %c1_i32 = arith.constant 1 : i32
    %0 = arith.muli %arg0, %c1_i32 : i32
    %1 = arith.addi %0, %arg1 : i32
    %c0_i32 = arith.constant 0 : i32
    %2 = arith.minsi %1, %c0_i32 : i32
    %c0_i32_0 = arith.constant 0 : i32
    %c0_i32_1 = arith.constant 0 : i32
    return %2, %c0_i32_0 : i32, i32
  }
  func.func @transform_2(%arg0: i32, %arg1: i32, %arg2: memref<1xi32, #tpu.memory_space<smem>>) -> (i32, i32) {
    %c0_i32 = arith.constant 0 : i32
    %c0_i32_0 = arith.constant 0 : i32
    return %arg0, %c0_i32 : i32, i32
  }
}

</mosaic_0001>

<bundles_post_ra>
// kernel: tpu_custom_call.1
= control target key start
LH: loop header
LB: loop body
LE: loop exit
PB: predicated region body
PF: predicated region fallthrough
CT: control target
= control target key end

     0   :  { %s946_s0 = inlined_call_operand.<no memory space> [shape: s32[1], index: 0, kind: input, shape index: {}]   ;;  %s947_s1 = inlined_call_operand.hbm [shape: f32[16,128], index: 1, kind: input, shape index: {}]   ;;  %s948_s2 = inlined_call_operand.hbm [shape: f32[16,128], index: 2, kind: input, shape index: {}]   ;;  %s949_s3 = inlined_call_operand.hbm [shape: f32[16,128], index: 3, kind: output, shape index: {}]  }
   0x1   :  { %8 = sst [smem:[#allocation3]] %s946_s0 }
   0x2   :  { %9 = vsyncpa [#allocation5], 0 }
   0x3   :  { %11 = vsyncpa [#allocation5 + $0x1], 0 }
   0x4   :  { %12 = vsyncpa [#allocation8], 0 }
   0x5   :  { %14 = vsyncpa [#allocation8 + $0x1], 0 }
   0x6   :  { %15 = vsyncpa [#allocation6], 0 }
   0x7   :  { %17 = vsyncpa [#allocation6 + $0x1], 0  ;;  %s725_s14 = smov 0   ;;  %s727_s15 = smov 0  }
   0x8   :  { %s729_s16 = smov 0   ;;  %s731_s17 = smov 0  }
   0x9   :  { %s733_s18 = smov 0   ;;  %s735_s19 = smov 0  }
   0xa   :  { %s737_s20 = smov 0   ;;  %s739_s0 = smov 0  }
   0xb LB: > { %s417_s21 = sadd.s32 4294967295, %s694_s0   ;;  %s418_s22 = sadd.s32 4294967294, %s694_s0   ;;  %s694_s0 = sphi %s739_s0, %s23_s0   ;;  %s690_s20 = sphi %s737_s20, %s969_s20   ;;  %s686_s19 = sphi %s735_s19, %s968_s19   ;;  %s682_s18 = sphi %s733_s18, %s936_s18   ;;  %s678_s17 = sphi %s731_s17, %s967_s17   ;;  %s674_s16 = sphi %s729_s16, %s966_s16   ;;  %s670_s15 = sphi %s727_s15, %s965_s15   ;;  %s666_s14 = sphi %s725_s14, %s964_s14  }
   0xc   : > { %s35_s23 = sadd.s32 1, %s690_s20  ;;  %p663_p1 = scmp.ne.s32.totalorder %s682_s18, 0 }
   0xd   : > { %p37_p0 = scmp.ge.s32.totalorder %s35_s23, 2  ;;  %p56_p2 = scmp.eq.s32.totalorder %s694_s0, 0 }
   0xe   : > { %p61_p3 = scmp.ne.s32.totalorder %s682_s18, %s678_s17  ;;  %p62_p5 = scmp.eq.s32.totalorder %s417_s21, 0 }
   0xf   : > { %s971_s23 = smov (%p37_p0, %s35_s23), 0  ;;  %p771_p4 = por %p663_p1, %p56_p2 }
  0x10   : > { %p775_p6 = por %p62_p5, %p61_p3  ;;  %s103_s26 = ssub.s32 %s690_s20, %s971_s23 }
  0x11   : > { %p104_p7 = scmp.eq.s32.totalorder %s103_s26, 0  ;;  %s106_s27 = sadd.s32 1, %s674_s16 }
  0x12   : > { %s953_s25 = scalar_select %p775_p6, 1, 0 }
  0x13   : > { %s783_s28 = scalar_select %p104_p7, %s674_s16, %s106_s27  }
  0x14   : > { %p116_p8 = scmp.ne.s32.totalorder %s674_s16, %s670_s15  ;;  %p117_p9 = scmp.eq.s32.totalorder %s417_s21, 1 }
  0x15   : > { %p122_p10 = scmp.ne.s32.totalorder %s670_s15, %s666_s14  ;;  %p123_p11 = scmp.eq.s32.totalorder %s418_s22, 1 }
  0x16   : > { %p789_p12 = por %p117_p9, %p116_p8  ;;  %p456_p1 = scmp.lt.s32.totalorder %s694_s0, 2 }
  0x17   : > { %p794_p0 = por %p123_p11, %p122_p10  ;;  %s696_s4 = smov [#allocation4]  }
  0x18   : > { %s954_s29 = scalar_select %p789_p12, 1, 0 }
  0x19   : > { %s955_s30 = scalar_select %p794_p0, 1, 0 }
  0x1a   : > { %s157_s5 = sshll.u32 %s696_s4, 4  ;;  %p801_p2 = pnand %p456_p1, %p771_p4  ;;  %s158_s5 = int_to_ptr.vmem [resolvable:$true] %s157_s5 }
  0x1b   : > { %s533_s9 = scalar_lea.hbm %s947_s1, 256 }
  0x1c   : > { %p534_p3 = scmp.ne.s32.totalorder %s947_s1, %s533_s9  ;;  %p535_p5 = pneg %p801_p2 }
  0x1d   : > { %p540_p8 = scmp.lt.s32.totalorder %s533_s9, %s533_s9 }
  0x1e   : > { %p536_p7 = pnand %p535_p5, %p534_p3 }
  0x20   : > { %p537_p4 = pneg %p536_p7 }
  0x22   : > { %p542_p9 = pnand %p540_p8, %p537_p4 }
  0x24   : > { %545 = shalt.err (!%p542_p9)
}
  0x25   : > { %s546_s12 = scalar_lea.vmem %s158_s5, 256  ;;  %s553_s13 = scalar_lea.vmem %s158_s5, 512 }
  0x26   : > { %p547_p10 = scmp.ne.s32.totalorder %s158_s5, %s546_s12  ;;  %p554_p13 = scmp.lt.s32.totalorder %s158_s5, %s158_s5 }
  0x27   : > { %p555_p0 = scmp.lt.s32.totalorder %s553_s13, %s546_s12 }
  0x28   : > { %p549_p11 = pnand %p547_p10, %p535_p5 }
  0x29   : > { %p556_p12 = por %p555_p0, %p554_p13 }
  0x2a   : > { %p550_p1 = pneg %p549_p11 }
  0x2c   : > { %p557_p6 = pnand %p556_p12, %p550_p1 }
  0x2e   : > { %560 = shalt.err (!%p557_p6)
}
  0x2f   : > { %s697_s17 = smov 128   ;;  %s698_s21 = smov 8  }
  0x30   : > { %448 = dma.hbm_to_vmem [thread:$0]  (!%p801_p2), %s947_s1, 256, %s158_s5, [#allocation5], %s697_s17, %s697_s17, %s698_s21  }
  0x31   : > { %p427_p3 = scmp.ge.s32.totalorder %s694_s0, 1  ;;  %p189_p7 = scmp.lt.s32.totalorder %s694_s0, 3 }
  0x32   : > { %s699_s27 = smov [#allocation7]   ;;  %s561_s9 = scalar_lea.hbm %s948_s2, 256 }
  0x33   : > { %p826_p4 = pnand %p427_p3, %p189_p7  ;;  %s181_s4 = sshll.u32 %s699_s27, 4  ;;  %s182_s4 = int_to_ptr.vmem [resolvable:$true] %s181_s4 }
  0x34   : > { %p562_p6 = scmp.ne.s32.totalorder %s948_s2, %s561_s9  ;;  %p568_p0 = scmp.lt.s32.totalorder %s561_s9, %s561_s9 }
  0x35   : > { %s957_s26 = scalar_select %p826_p4, 1, 0 }
  0x36   : > { %p564_p12 = pnand %p562_p6, %p535_p5 }
  0x38   : > { %p565_p13 = pneg %p564_p12 }
  0x3a   : > { %p570_p8 = pnand %p568_p0, %p565_p13 }
  0x3c   : > { %573 = shalt.err (!%p570_p8)
}
  0x3d   : > { %s574_s5 = scalar_lea.vmem %s182_s4, 256  ;;  %s581_s12 = scalar_lea.vmem %s182_s4, 512 }
  0x3e   : > { %p575_p9 = scmp.ne.s32.totalorder %s182_s4, %s574_s5  ;;  %p582_p1 = scmp.lt.s32.totalorder %s182_s4, %s182_s4 }
  0x3f   : > { %p583_p3 = scmp.lt.s32.totalorder %s581_s12, %s574_s5 }
  0x40   : > { %p577_p10 = pnand %p575_p9, %p535_p5 }
  0x41   : > { %p584_p7 = por %p583_p3, %p582_p1 }
  0x42   : > { %p578_p11 = pneg %p577_p10 }
  0x44   : > { %p585_p4 = pnand %p584_p7, %p578_p11 }
  0x46   : > { %588 = shalt.err (!%p585_p4)
}
  0x47   : > { %451 = dma.hbm_to_vmem [thread:$0]  (!%p801_p2), %s948_s2, 256, %s182_s4, [#allocation8], %s697_s17, %s697_s17, %s698_s21  }
  0x48   : > { %p958_p6 = scmp.ne.s32.totalorder %s957_s26, 0 }
  0x49   : > { %s195_s24 = sand.u32 (!%p958_p6), 1, %s682_s18   ;;  %p959_p5 = scmp.ne.s32.totalorder (!%p958_p6), %s953_s25, 0 }
  0x4a   : > { %193 = sbr.rel (%p958_p6) target bundleno = 161 (0xa1), region = 28  ;;  %s428_s27 = sshll.u32 (!%p958_p6), %s195_s24, 4 }
  0x4b   : > { %s196_s7 = scalar_lea.sflag (!%p958_p6), [#allocation5], %s195_s24  ;;  %s850_s8 = scalar_lea.vmem (!%p958_p6), [#allocation4], %s428_s27 }
  0x4f   : > { %652 = dma.done.wait (%p959_p5), %s196_s7, 256  }
  0x50   : > { %654 = vsyncadd (%p959_p5), %s196_s7, 4294967040  ;;  %s205_s6 = scalar_lea.sflag [#allocation8], %s195_s24  ;;  %s856_s9 = scalar_lea.vmem [#allocation7], %s428_s27 }
  0x51   : > { %656 = dma.done.wait (%p959_p5), %s205_s6, 256  }
  0x52   : > { %658 = vsyncadd (%p959_p5), %s205_s6, 4294967040  ;;  %s231_s17 = sand.u32 1, %s670_s15   ;;  %s864_s21 = sshll.u32 %s686_s19, 11  ;;  %v700_v0 = vmov 0.0  }
  0x53   : > { %s866_s26 = sld [smem:[#allocation3]]  ;;  %s430_s4 = sshll.u32 %s231_s17, 3 }
  0x54   : > { %s250_s10 = sadd.s32 2048, %s864_s21  ;;  %s871_s11 = scalar_lea.vmem [#allocation9], %s430_s4 }
  0x55   : > { %246 = vst [vmem:[%s871_s11] sm:$0xff] %v700_v0 }
  0x59   : > { %p875_p2 = scmp.gt.s32.totalorder %s250_s10, %s866_s26 }
  0x5b   : > { %254 = sbr.rel (%p875_p2) target bundleno = 107 (0x6b), region = 44 }
  0x60   : > { %v255_v1 = vld [vmem:[%s850_s8] sm:$0xff]  ;;  %v256_v2 = vld [vmem:[%s850_s8 + $0x8] sm:$0xff] }
  0x61   : > { %v257_v3 = vld [vmem:[%s856_s9] sm:$0xff]  ;;  %v258_v4 = vld [vmem:[%s856_s9 + $0x8] sm:$0xff] }
  0x62   : > { %v259_v5 = vsub.f32 %v255_v1, %v257_v3  ;;  %v260_v6 = vsub.f32 %v256_v2, %v258_v4  ;;  %v263_v9 = vld [vmem:[%s871_s11] sm:$0xff] }
  0x64   : > { %v261_v7 = vmul.f32 %v259_v5, %v259_v5  ;;  %v262_v8 = vmul.f32 %v260_v6, %v260_v6 }
  0x66   : > { %v264_v10 = vadd.f32 %v262_v8, %v261_v7 }
  0x68   : > { %v265_v11 = vadd.f32 %v264_v10, %v263_v9 }
  0x6a   : > { %266 = vst [vmem:[%s871_s11] sm:$0xff] %v265_v11 }
  0x6b PF: > { %p267_p4 = scmp.lt.s32.totalorder %s864_s21, %s866_s26 }
  0x6d   : > { %p269_p12 = pnand %p875_p2, %p267_p4 }
  0x6f   : > { %272 = sbr.rel (%p269_p12) target bundleno = 137 (0x89), region = 48 }
  0x74   : > { %v279_v12 = vlaneseq  ;;  %v286_v14 = vstv %s864_s21  ;;  %v273_v15 = vld [vmem:[%s850_s8] sm:$0xff]  ;;  %v274_v20 = vld [vmem:[%s850_s8 + $0x8] sm:$0xff]  ;;  %v291_v25 = vstv %s866_s26 }
  0x75   : > { %v275_v16 = vld [vmem:[%s856_s9] sm:$0xff]  ;;  %v276_v21 = vld [vmem:[%s856_s9 + $0x8] sm:$0xff] }
  0x76   : > { %v280_v13 = vshrl.u32 %v279_v12, 7  ;;  %v283_v18 = vand.u32 127, %v279_v12  ;;  %v277_v24 = vsub.f32 %v273_v15, %v275_v16  ;;  %v278_v28 = vsub.f32 %v274_v20, %v276_v21  ;;  %v298_v34 = vld [vmem:[%s871_s11] sm:$0xff] }
  0x78   : > { %v281_v17 = vadd.s32 8, %v280_v13  ;;  %v284_v19 = vmul.u32 128, %v280_v13 }
  0x7a   : > { %v285_v22 = vmul.u32 128, %v281_v17  ;;  %v287_v23 = vadd.s32 %v286_v14, %v284_v19 }
  0x7c   : > { %v288_v26 = vadd.s32 %v286_v14, %v285_v22  ;;  %v289_v27 = vadd.s32 %v287_v23, %v283_v18 }
  0x7e   : > { %v290_v29 = vadd.s32 %v288_v26, %v283_v18  ;;  %vm292_vm0 = vcmp.lt.s32.totalorder %v289_v27, %v291_v25 }
  0x7f   : > { %v294_v30 = vsel %vm292_vm0, %v277_v24, 0.0 }
  0x80   : > { %vm293_vm1 = vcmp.lt.s32.totalorder %v290_v29, %v291_v25  ;;  %v296_v31 = vmul.f32 %v294_v30, %v294_v30 }
  0x81   : > { %v295_v32 = vsel %vm293_vm1, %v278_v28, 0.0 }
  0x82   : > { %v297_v33 = vmul.f32 %v295_v32, %v295_v32 }
  0x84   : > { %v299_v35 = vadd.f32 %v297_v33, %v296_v31 }
  0x86   : > { %v300_v36 = vadd.f32 %v299_v35, %v298_v34 }
  0x88   : > { %301 = vst [vmem:[%s871_s11] sm:$0xff] %v300_v36 }
  0x89 PF: > { %s434_s5 = sshll.u32 %s686_s19, 7  ;;  %s316_s24 = sshll.u32 %s871_s11, 4  ;;  %s317_s24 = int_to_ptr.vmem [resolvable:$true] %s316_s24 }
  0x8a   : > { %s314_s22 = scalar_lea.hbm %s949_s3, %s434_s5  ;;  %s303_s27 = scalar_lea.sflag [#allocation6], %s231_s17 }
  0x8b   : > { %s589_s7 = scalar_lea.vmem %s317_s24, 128  ;;  %p961_p0 = scmp.ne.s32.totalorder %s954_s29, 0 }
  0x8c   : > { %p590_p13 = scmp.ne.s32.totalorder %s317_s24, %s589_s7  ;;  %s701_s8 = smov [#allocation9]  }
  0x8d   : > { %s593_s6 = sshll.u32 %s701_s8, 4  ;;  %s594_s6 = int_to_ptr.vmem [resolvable:$false] %s593_s6 }
  0x8e   : > { %p591_p8 = pnand %p590_p13, %p961_p0  ;;  %s595_s9 = scalar_lea.vmem %s594_s6, 256 }
  0x8f   : > { %p596_p10 = scmp.lt.s32.totalorder %s317_s24, %s594_s6  ;;  %p597_p11 = scmp.lt.s32.totalorder %s595_s9, %s589_s7 }
  0x90   : > { %p592_p9 = pneg %p591_p8 }
  0x91   : > { %p598_p1 = por %p597_p11, %p596_p10 }
  0x93   : > { %p599_p3 = pnand %p598_p1, %p592_p9 }
  0x95   : > { %602 = shalt.err (!%p599_p3)
}
  0x96   : > { %s603_s19 = scalar_lea.hbm %s314_s22, 128  ;;  %s607_s26 = scalar_lea.hbm %s949_s3, 256 }
  0x97   : > { %p604_p7 = scmp.ne.s32.totalorder %s314_s22, %s603_s19  ;;  %p608_p2 = scmp.lt.s32.totalorder %s314_s22, %s949_s3 }
  0x98   : > { %p609_p4 = scmp.lt.s32.totalorder %s607_s26, %s603_s19 }
  0x99   : > { %p605_p6 = pnand %p604_p7, %p961_p0 }
  0x9a   : > { %p610_p12 = por %p609_p4, %p608_p2 }
  0x9b   : > { %p606_p5 = pneg %p605_p6 }
  0x9d   : > { %p611_p13 = pnand %p610_p12, %p606_p5 }
  0x9f   : > { %614 = shalt.err (!%p611_p13)
}
  0xa0   : > { %443 = dma.vmem_to_hbm [thread:$0]  (%p961_p0), %s317_s24, 128, %s314_s22, %s303_s27  }
  0xa1 PF: > { %s328_s11 = sand.u32 1, %s666_s14   ;;  %p962_p8 = scmp.ne.s32.totalorder %s955_s30, 0 }
  0xa2   : > { %p963_p9 = scmp.ge.s32.totalorder %s694_s0, 2  ;;  %s329_s25 = scalar_lea.sflag [#allocation6], %s328_s11 }
  0xa4   : > { %p453_p10 = pnand %p963_p9, %p962_p8 }
  0xa6   : > { %p454_p11 = pneg %p453_p10 }
  0xa8   : > { %660 = dma.done.wait (%p454_p11), %s329_s25, 128  }
  0xa9   : > { %662 = vsyncadd (%p454_p11), %s329_s25, 4294967168  ;;  %s23_s0 = sadd.s32 1, %s694_s0   ;;  %s964_s14 = smov %s670_s15 }
  0xaa   : > { %p20_p1 = scmp.ge.s32.totalorder %s23_s0, 4   ;;  %s965_s15 = smov %s674_s16 }
  0xab   : > { %s966_s16 = smov %s783_s28  ;;  %s967_s17 = smov %s682_s18 }
  0xac   : > { %s936_s18 = smov 0   ;;  %s968_s19 = smov %s690_s20 }
  0xad   : > { %s969_s20 = smov %s971_s23  ;;  %22 = sbr.rel (!%p20_p1) target bundleno = 11 (0xb), region = 98 }
  0xb2   :  { %334 = vsyncpa [#allocation5], 1 }
  0xb3   :  { %336 = vsyncpa [#allocation5 + $0x1], 1 }
  0xb4   :  { %337 = vsyncpa [#allocation8], 1 }
  0xb5   :  { %339 = vsyncpa [#allocation8 + $0x1], 1 }
  0xb6   :  { %340 = vsyncpa [#allocation6], 1 }
  0xb7   :  { %342 = vsyncpa [#allocation6 + $0x1], 1 }

</bundles_post_ra>
